<compile_context>
chip_gen: v7x
topology: tpu7x:2x2x1
jax: 0.10.0
libtpu: 0.0.40
codegen_flags: <defaults>
</compile_context>

<pallas_src>
import functools

import jax
import jax.numpy as jnp
from jax.experimental import pallas as pl
from jax.experimental.pallas import tpu as pltpu


def _round_up(x, m):
    return ((x + m - 1) // m) * m


# --------------------------------------------------------------------------- kernel
def _plrec_tile_kernel(use_user_emb, n_kp, compute_dtype, *refs):
    if use_user_emb:
        (user_kps_ref, gamma_u_ref, gamma_i_ref, gamma_j_ref, target_ref,
         w_enc_ref, b_enc_ref, w_proj_ref, b_proj_ref,
         kps_ui_ref, stats_ref) = refs
    else:
        (user_kps_ref, gamma_i_ref, gamma_j_ref, target_ref,
         w_enc_ref, b_enc_ref, w_proj_ref, b_proj_ref,
         kps_ui_ref, stats_ref) = refs
        gamma_u_ref = None

    # kp_encoder: Linear(n_kp -> k). bf16 operands -> single native MXU pass,
    # f32 accumulation.
    latent_u = jnp.dot(user_kps_ref[...].astype(compute_dtype),
                       w_enc_ref[...].astype(compute_dtype),
                       preferred_element_type=jnp.float32)
    latent_u = latent_u + b_enc_ref[...].astype(jnp.float32)
    if use_user_emb:
        latent_u = latent_u + gamma_u_ref[...].astype(jnp.float32)

    latent_i = gamma_i_ref[...].astype(jnp.float32)
    latent_j = gamma_j_ref[...].astype(jnp.float32)

    x_ui = jnp.sum(latent_u * latent_i, axis=-1, keepdims=True)     # [TB, 1]
    x_uj = jnp.sum(latent_u * latent_j, axis=-1, keepdims=True)     # [TB, 1]

    # kp_proj: Linear(k -> n_kp) on (latent_u + latent_i); bf16 MXU, f32 acc.
    kps_ui = jnp.dot((latent_u + latent_i).astype(compute_dtype),
                     w_proj_ref[...].astype(compute_dtype),
                     preferred_element_type=jnp.float32)
    kps_ui = kps_ui + b_proj_ref[...].astype(jnp.float32)
    kps_ui_ref[...] = kps_ui.astype(kps_ui_ref.dtype)   # bf16 store halves writeback

    # Stable BCE-with-logits per-row sum: max(x,0) - x*t + log1p(exp(-|x|)).
    t = target_ref[...].astype(jnp.float32)
    bce = jnp.maximum(kps_ui, 0.0) - kps_ui * t + jnp.log1p(jnp.exp(-jnp.abs(kps_ui)))
    n_kp_pad = bce.shape[-1]
    if n_kp_pad != n_kp:
        # Zero-padded logit columns would each contribute log(2): mask them out.
        lane = jax.lax.broadcasted_iota(jnp.int32, bce.shape, 1)
        bce = jnp.where(lane < n_kp, bce, 0.0)
    bce_row = jnp.sum(bce, axis=-1, keepdims=True)                   # [TB, 1]

    # -logsigmoid(x_ui - x_uj) = softplus(-(x_ui - x_uj)) per row.
    d = x_ui - x_uj
    bpr_row = jnp.maximum(-d, 0.0) + jnp.log1p(jnp.exp(-jnp.abs(d)))  # [TB, 1]

    # Per-row stats via four narrow column stores; the wrapper does the two tiny
    # means, so there is no cross-tile accumulator and partial tiles need no mask.
    stats_ref[:, 0:1] = x_ui
    stats_ref[:, 1:2] = x_uj
    stats_ref[:, 2:3] = bce_row
    stats_ref[:, 3:4] = bpr_row


# ------------------------------------------------------------------ one-time prep
def prepare_plrec_params(params, *, compute_dtype=jnp.bfloat16, lane_multiple=128):
    """One-time prep (outside the hot path): pre-transpose the Linear weights to
    [in, out], cast them to the MXU compute dtype, zero-pad the n_kp (lane) axis up
    to a multiple of 128 so the dominant (B, n_kp) streams are lane-dense, and
    reshape biases to 2-D so the kernel does plain `x @ W + b`."""
    k, n_kp = params["kp_encoder_w"].shape
    n_kp_pad = _round_up(n_kp, lane_multiple)
    pad = n_kp_pad - n_kp

    w_enc = jnp.asarray(params["kp_encoder_w"]).T            # [n_kp, k]
    w_proj = jnp.asarray(params["kp_proj_w"]).T              # [k, n_kp]
    b_proj = jnp.asarray(params["kp_proj_b"], jnp.float32).reshape(1, n_kp)
    if pad:
        w_enc = jnp.pad(w_enc, ((0, pad), (0, 0)))
        w_proj = jnp.pad(w_proj, ((0, 0), (0, pad)))
        b_proj = jnp.pad(b_proj, ((0, 0), (0, pad)))

    out = dict(params)
    out["kp_encoder_wT"] = w_enc.astype(compute_dtype)        # [n_kp_pad, k]
    out["kp_encoder_b2"] = jnp.asarray(params["kp_encoder_b"], jnp.float32).reshape(1, k)
    out["kp_proj_wT"] = w_proj.astype(compute_dtype)           # [k, n_kp_pad]
    out["kp_proj_b2"] = b_proj                                  # [1, n_kp_pad] f32
    out["n_kp"] = int(n_kp)
    out["n_kp_pad"] = int(n_kp_pad)
    return out


# -------------------------------------------------------- hardware-aware tile sizing
def _device_kind():
    try:
        return jax.devices()[0].device_kind.lower()
    except Exception:
        return ""


def _num_tensorcores_per_chip():
    kind = _device_kind()
    return 2 if ("v7" in kind or "tpu7" in kind) else 1


def _vmem_limit_bytes():
    cap = None
    try:
        cap = getattr(pltpu.get_tpu_info(), "vmem_capacity_bytes", None)
    except Exception:
        cap = None
    if not cap:
        cap = 64 * 1024 * 1024            # conservative fallback (v7x per-core VMEM)
    # ~3/4 of physical, capped: ~96 MiB on v5e/v6e (128 MiB parts), <=48 MiB on v7x.
    limit = min(int(cap) * 3 // 4, 100 * 1024 * 1024)
    kind = _device_kind()
    if "v7" in kind or "tpu7" in kind:
        limit = min(limit, 48 * 1024 * 1024)
    return limit


def _pick_tile_b(B, per_row_bytes, resident_bytes, vmem_limit_bytes, n_tc):
    budget = int(vmem_limit_bytes * 0.85) - resident_bytes
    tb = max(16, budget // max(per_row_bytes, 1))
    tb = min(tb, 2048)
    if n_tc > 1 and B >= 16:
        # v7x: force >= n_tc grid steps so the "parallel" batch axis shards across
        # both TensorCores instead of running a 1-step grid on a single core.
        tb = min(tb, _round_up(pl.cdiv(B, n_tc), 8))
    if tb >= B:
        return B
    return max(8, (tb // 8) * 8)


# ------------------------------------------------------------------------- wrapper
def plrec_forward(params, u, i, j, target_kps, user_kps, *,
                  use_user_emb=True, compute_dtype=jnp.bfloat16,
                  kps_out_dtype=jnp.bfloat16, tile_b=None):
    """Hot path (2 small matmuls, scores, per-row BCE + BPR terms) runs in a Pallas
    kernel over a 1-D batch grid; embedding-row gathers, lane padding and the two
    tiny means stay as XLA glue. Pass compute_dtype=kps_out_dtype=jnp.float32 to
    reproduce the PyTorch numerics exactly."""
    B = user_kps.shape[0]
    n_kp = params["n_kp"]
    n_kp_pad = params["n_kp_pad"]
    k = params["gamma_i"].shape[1]

    # Lane-pad the per-batch KP streams to n_kp_pad (multiple of 128 lanes).
    # TODO(synk): have the data pipeline emit lane-padded user_kps/target_kps so this
    # pad (an extra HBM pass over the two dominant streams) disappears.
    def _pad_lanes(x):
        p = n_kp_pad - x.shape[1]
        return x if p == 0 else jnp.pad(x, ((0, 0), (0, p)))
    user_kps = _pad_lanes(user_kps)
    target_kps = _pad_lanes(target_kps)

    # Gather first; never cast the whole table (tables stay in their stored dtype,
    # the kernel casts per tile).
    gamma_i_i = params["gamma_i"][i]                           # [B, k]
    gamma_i_j = params["gamma_i"][j]                           # [B, k]
    gamma_u_u = params["gamma_u"][u] if use_user_emb else None  # [B, k]
    # TODO(synk): for k >= 128 (>=512 B rows) fuse these gathers into the kernel via
    # scalar prefetch + pl.Element row index_maps to save one HBM round trip.

    # ----- tile size from a per-generation VMEM budget ---------------------------
    emb_b = params["gamma_i"].dtype.itemsize
    uk_b = user_kps.dtype.itemsize
    tg_b = target_kps.dtype.itemsize
    out_b = jnp.dtype(kps_out_dtype).itemsize
    cmp_b = jnp.dtype(compute_dtype).itemsize
    n_emb = 3 if use_user_emb else 2

    stream_row = n_kp_pad * (uk_b + tg_b + out_b) + n_emb * k * emb_b + 4 * 4
    interm_row = 4 * (4 * k + 4 * n_kp_pad)        # f32 latents / logits / bce temps
    per_row = 2 * stream_row + interm_row          # x2: double-buffered BlockSpecs
    # TODO(synk): single-buffer the constant weight specs (pipeline_mode=pl.Buffered(1))
    # once verified on this Pallas version; until then budget them double-buffered.
    resident = 2 * (2 * n_kp_pad * k * cmp_b + 4 * (k + n_kp_pad))

    vmem_limit = _vmem_limit_bytes()
    n_tc = _num_tensorcores_per_chip()
    if tile_b is None:
        tb = _pick_tile_b(B, per_row, resident, vmem_limit, n_tc)
    elif tile_b >= B:
        tb = B
    else:
        tb = max(8, (tile_b // 8) * 8)
    grid = (pl.cdiv(B, tb),)

    batch_spec = lambda feat: pl.BlockSpec((tb, feat), lambda t: (t, 0))
    const_spec = lambda r, c: pl.BlockSpec((r, c), lambda t: (0, 0))   # VMEM-resident

    in_specs = [batch_spec(n_kp_pad)]
    operands = [user_kps]                           # native dtype; cast in-kernel
    if use_user_emb:
        in_specs.append(batch_spec(k))
        operands.append(gamma_u_u)
    in_specs += [batch_spec(k), batch_spec(k), batch_spec(n_kp_pad),
                 const_spec(n_kp_pad, k), const_spec(1, k),
                 const_spec(k, n_kp_pad), const_spec(1, n_kp_pad)]
    operands += [gamma_i_i, gamma_i_j, target_kps,
                 params["kp_encoder_wT"], params["kp_encoder_b2"],
                 params["kp_proj_wT"], params["kp_proj_b2"]]

    out_shape = (jax.ShapeDtypeStruct((B, n_kp_pad), kps_out_dtype),   # kps_ui
                 jax.ShapeDtypeStruct((B, 4), jnp.float32))  # [x_ui, x_uj, bce, bpr]
    out_specs = (batch_spec(n_kp_pad), batch_spec(4))

    bytes_accessed = B * stream_row + resident // 2
    flops = 4 * B * n_kp_pad * k + B * (6 * k + 10 * n_kp_pad + 10)
    transcendentals = 2 * B * (n_kp_pad + 1)

    kps_ui, stats = pl.pallas_call(
        functools.partial(_plrec_tile_kernel, use_user_emb, n_kp, compute_dtype),
        grid=grid,
        in_specs=in_specs,
        out_specs=out_specs,
        out_shape=out_shape,
        compiler_params=pltpu.CompilerParams(
            dimension_semantics=("parallel",),
            vmem_limit_bytes=vmem_limit,
        ),
        cost_estimate=pl.CostEstimate(
            flops=flops,
            transcendentals=transcendentals,
            bytes_accessed=bytes_accessed),
    )(*operands)

    x_ui = stats[:, 0]
    x_uj = stats[:, 1]
    kp_loss = jnp.sum(stats[:, 2]) / (B * n_kp)
    bpr_loss = jnp.mean(stats[:, 3])
    if n_kp_pad != n_kp:
        kps_ui = kps_ui[:, :n_kp]
    return x_ui, x_uj, kps_ui, bpr_loss, kp_loss


# ---------------------------------------------------------------- reference + test
def _reference_forward(params, u, i, j, target_kps, user_kps, use_user_emb=True):
    latent_u = user_kps @ params["kp_encoder_w"].T + params["kp_encoder_b"]
    if use_user_emb:
        latent_u = latent_u + params["gamma_u"][u]
    latent_i = params["gamma_i"][i]
    latent_j = params["gamma_i"][j]
    x_ui = jnp.sum(latent_u * latent_i, axis=-1)
    x_uj = jnp.sum(latent_u * latent_j, axis=-1)
    kps_ui = (latent_u + latent_i) @ params["kp_proj_w"].T + params["kp_proj_b"]
    t = target_kps.astype(jnp.float32)
    bce = jnp.maximum(kps_ui, 0.0) - kps_ui * t + jnp.log1p(jnp.exp(-jnp.abs(kps_ui)))
    kp_loss = jnp.mean(bce)
    d = x_ui - x_uj
    bpr = jnp.mean(jnp.maximum(-d, 0.0) + jnp.log1p(jnp.exp(-jnp.abs(d))))
    return x_ui, x_uj, kps_ui, bpr, kp_loss


def _make_case(key, B, k, n_kp, n_items, n_users):
    ks = jax.random.split(key, 10)
    params = {
        "gamma_i": jax.random.normal(ks[0], (n_items, k), jnp.float32),     # nn.Embedding
        "gamma_u": jax.random.normal(ks[1], (n_users, k), jnp.float32),     # nn.Embedding
        "kp_encoder_w": jax.random.normal(ks[2], (k, n_kp), jnp.float32) * (1.0 / jnp.sqrt(n_kp)),
        "kp_encoder_b": jax.random.normal(ks[3], (k,), jnp.float32) * 0.1,
        "kp_proj_w": jax.random.normal(ks[4], (n_kp, k), jnp.float32) * (1.0 / jnp.sqrt(k)),
        "kp_proj_b": jax.random.normal(ks[5], (n_kp,), jnp.float32) * 0.1,
    }
    u = jax.random.randint(ks[6], (B,), 0, n_users, jnp.int32)
    i = jax.random.randint(ks[7], (B,), 0, n_items, jnp.int32)
    j = jax.random.randint(ks[8], (B,), 0, n_items, jnp.int32)
    # target_kps is 0/1 -> bf16 is lossless and halves its HBM stream.
    target_kps = (jax.random.uniform(ks[9], (B, n_kp)) > 0.5).astype(jnp.bfloat16)
    user_kps = jax.random.uniform(ks[0], (B, n_kp), jnp.float32)
    return params, u, i, j, target_kps, user_kps


def _check(params, u, i, j, target_kps, user_kps, use_user_emb, *,
           compute_dtype, kps_out_dtype, tile_b=None):
    prepared = prepare_plrec_params(params, compute_dtype=compute_dtype)
    out = plrec_forward(prepared, u, i, j, target_kps, user_kps,
                        use_user_emb=use_user_emb, compute_dtype=compute_dtype,
                        kps_out_dtype=kps_out_dtype, tile_b=tile_b)
    out = jax.block_until_ready(out)
    ref = _reference_forward(params, u, i, j, target_kps, user_kps,
                             use_user_emb=use_user_emb)
    exact = (compute_dtype == jnp.float32 and kps_out_dtype == jnp.float32)
    atol, rtol = (2e-4, 2e-4) if exact else (1.5e-1, 6e-2)
    for a, b in zip(out, ref):
        a = jnp.asarray(a, jnp.float32)
        b = jnp.asarray(b, jnp.float32)
        assert jnp.allclose(a, b, atol=atol, rtol=rtol), (a, b)


if __name__ == "__main__":
    key = jax.random.PRNGKey(0)
    k1, k2 = jax.random.split(key)

    # Case 1: small shapes, single tile; exercise with / without the user embedding
    # and both the exact-f32 and the fast bf16 paths.
    case1 = _make_case(k1, B=8, k=32, n_kp=16, n_items=64, n_users=32)
    _check(*case1, use_user_emb=True,
           compute_dtype=jnp.float32, kps_out_dtype=jnp.float32)
    _check(*case1, use_user_emb=True,
           compute_dtype=jnp.bfloat16, kps_out_dtype=jnp.bfloat16)
    _check(*case1, use_user_emb=False,
           compute_dtype=jnp.bfloat16, kps_out_dtype=jnp.bfloat16)

    # Case 2: multi-tile grid with a partial last tile (B=80, TILE_B=32 -> 3 steps),
    # plus the auto-derived (VMEM-budget) tile size.
    case2 = _make_case(k2, B=80, k=32, n_kp=24, n_items=128, n_users=96)
    _check(*case2, use_user_emb=True,
           compute_dtype=jnp.bfloat16, kps_out_dtype=jnp.bfloat16, tile_b=32)
    _check(*case2, use_user_emb=True,
           compute_dtype=jnp.float32, kps_out_dtype=jnp.float32)  # auto tile size

    print("KERNEL_OK")
</pallas_src>

<mosaic_0001>
module attributes {stable_mosaic.version = 11 : i64} {
  func.func @_plrec_tile_kernel(%arg0: i32, %arg1: memref<8x128xf32, #tpu.memory_space<vmem>>, %arg2: memref<8x32xf32, #tpu.memory_space<vmem>>, %arg3: memref<8x32xf32, #tpu.memory_space<vmem>>, %arg4: memref<8x32xf32, #tpu.memory_space<vmem>>, %arg5: memref<8x128xbf16, #tpu.memory_space<vmem>>, %arg6: memref<128x32xf32, #tpu.memory_space<vmem>>, %arg7: memref<1x32xf32, #tpu.memory_space<vmem>>, %arg8: memref<32x128xf32, #tpu.memory_space<vmem>>, %arg9: memref<1x128xf32, #tpu.memory_space<vmem>>, %arg10: memref<8x128xf32, #tpu.memory_space<vmem>>, %arg11: memref<8x4xf32, #tpu.memory_space<vmem>>) attributes {dimension_semantics = [#tpu.dimension_semantics<parallel>], iteration_bounds = array<i64: 1>, scalar_prefetch = 0 : i64, scratch_operands = 0 : i64, tpu.core_type = #tpu.core_type<tc>, window_params = [{transform_indices = @transform_0, window_bounds = array<i64: 8, 128>}, {transform_indices = @transform_1, window_bounds = array<i64: 8, 32>}, {transform_indices = @transform_2, window_bounds = array<i64: 8, 32>}, {transform_indices = @transform_3, window_bounds = array<i64: 8, 32>}, {transform_indices = @transform_4, window_bounds = array<i64: 8, 128>}, {pipeline_mode = #tpu.pipeline_mode<synchronous>, transform_indices = @transform_5, window_bounds = array<i64: 128, 32>}, {pipeline_mode = #tpu.pipeline_mode<synchronous>, transform_indices = @transform_6, window_bounds = array<i64: 1, 32>}, {pipeline_mode = #tpu.pipeline_mode<synchronous>, transform_indices = @transform_7, window_bounds = array<i64: 32, 128>}, {pipeline_mode = #tpu.pipeline_mode<synchronous>, transform_indices = @transform_8, window_bounds = array<i64: 1, 128>}, {transform_indices = @transform_9, window_bounds = array<i64: 8, 128>}, {transform_indices = @transform_10, window_bounds = array<i64: 8, 4>}]} {
    %c0 = arith.constant 0 : index
    %c0_0 = arith.constant 0 : index
    %0 = vector.load %arg1[%c0, %c0_0] : memref<8x128xf32, #tpu.memory_space<vmem>>, vector<8x128xf32>
    %c0_1 = arith.constant 0 : index
    %c0_2 = arith.constant 0 : index
    %1 = vector.load %arg6[%c0_1, %c0_2] : memref<128x32xf32, #tpu.memory_space<vmem>>, vector<128x32xf32>
    %cst = arith.constant dense<0.000000e+00> : vector<8x32xf32>
    %2 = tpu.matmul %0, %1, %cst {dimension_numbers = #tpu.dot_dimension_numbers<[1], [0], [0], [1], [0, 0, 1, 1], [], []>} : vector<8x128xf32>, vector<128x32xf32>, vector<8x32xf32> -> vector<8x32xf32>
    %c0_3 = arith.constant 0 : index
    %c0_4 = arith.constant 0 : index
    %3 = vector.load %arg7[%c0_3, %c0_4] : memref<1x32xf32, #tpu.memory_space<vmem>>, vector<1x32xf32>
    %4 = vector.broadcast %3 : vector<1x32xf32> to vector<8x32xf32>
    %5 = arith.addf %2, %4 : vector<8x32xf32>
    %c0_5 = arith.constant 0 : index
    %c0_6 = arith.constant 0 : index
    %6 = vector.load %arg2[%c0_5, %c0_6] : memref<8x32xf32, #tpu.memory_space<vmem>>, vector<8x32xf32>
    %7 = arith.addf %5, %6 : vector<8x32xf32>
    %c0_7 = arith.constant 0 : index
    %c0_8 = arith.constant 0 : index
    %8 = vector.load %arg3[%c0_7, %c0_8] : memref<8x32xf32, #tpu.memory_space<vmem>>, vector<8x32xf32>
    %c0_9 = arith.constant 0 : index
    %c0_10 = arith.constant 0 : index
    %9 = vector.load %arg4[%c0_9, %c0_10] : memref<8x32xf32, #tpu.memory_space<vmem>>, vector<8x32xf32>
    %10 = arith.mulf %7, %8 : vector<8x32xf32>
    %cst_11 = arith.constant dense<0.000000e+00> : vector<8xf32>
    %11 = vector.multi_reduction <add>, %10, %cst_11 [1] : vector<8x32xf32> to vector<8xf32>
    %12 = vector.shape_cast %11 : vector<8xf32> to vector<8x1xf32>
    %13 = arith.mulf %7, %9 : vector<8x32xf32>
    %cst_12 = arith.constant dense<0.000000e+00> : vector<8xf32>
    %14 = vector.multi_reduction <add>, %13, %cst_12 [1] : vector<8x32xf32> to vector<8xf32>
    %15 = vector.shape_cast %14 : vector<8xf32> to vector<8x1xf32>
    %16 = arith.addf %7, %8 : vector<8x32xf32>
    %c0_13 = arith.constant 0 : index
    %c0_14 = arith.constant 0 : index
    %17 = vector.load %arg8[%c0_13, %c0_14] : memref<32x128xf32, #tpu.memory_space<vmem>>, vector<32x128xf32>
    %cst_15 = arith.constant dense<0.000000e+00> : vector<8x128xf32>
    %18 = tpu.matmul %16, %17, %cst_15 {dimension_numbers = #tpu.dot_dimension_numbers<[1], [0], [0], [1], [0, 0, 1, 1], [], []>} : vector<8x32xf32>, vector<32x128xf32>, vector<8x128xf32> -> vector<8x128xf32>
    %c0_16 = arith.constant 0 : index
    %c0_17 = arith.constant 0 : index
    %19 = vector.load %arg9[%c0_16, %c0_17] : memref<1x128xf32, #tpu.memory_space<vmem>>, vector<1x128xf32>
    %20 = vector.broadcast %19 : vector<1x128xf32> to vector<8x128xf32>
    %21 = arith.addf %18, %20 : vector<8x128xf32>
    %c0_18 = arith.constant 0 : index
    %c0_19 = arith.constant 0 : index
    %22 = vector.load %arg10[%c0_18, %c0_19] : memref<8x128xf32, #tpu.memory_space<vmem>>, vector<8x128xf32>
    tpu.vector_store %arg10[%c0_18, %c0_19], %21 {strides = array<i32>} : memref<8x128xf32, #tpu.memory_space<vmem>>, vector<8x128xf32>,
    %c0_20 = arith.constant 0 : index
    %c0_21 = arith.constant 0 : index
    %23 = vector.load %arg5[%c0_20, %c0_21] : memref<8x128xbf16, #tpu.memory_space<vmem>>, vector<8x128xbf16>
    %24 = arith.extf %23 : vector<8x128xbf16> to vector<8x128xf32>
    %cst_22 = arith.constant 0.000000e+00 : f32
    %25 = vector.broadcast %cst_22 : f32 to vector<8x128xf32>
    %26 = arith.maximumf %21, %25 : vector<8x128xf32>
    %27 = arith.mulf %21, %24 : vector<8x128xf32>
    %28 = arith.subf %26, %27 : vector<8x128xf32>
    %29 = math.absf %21 : vector<8x128xf32>
    %cst_23 = arith.constant 0.000000e+00 : f32
    %30 = vector.broadcast %cst_23 : f32 to vector<8x128xf32>
    %31 = arith.subf %30, %29 : vector<8x128xf32>
    %32 = math.exp %31 : vector<8x128xf32>
    %33 = math.log1p %32 : vector<8x128xf32>
    %34 = arith.addf %28, %33 : vector<8x128xf32>
    %35 = tpu.iota {dimensions = array<i32: 1>} : vector<8x128xi32>
    %c16_i32 = arith.constant 16 : i32
    %36 = vector.broadcast %c16_i32 : i32 to vector<8x128xi32>
    %37 = arith.cmpi slt, %35, %36 : vector<8x128xi32>
    %cst_24 = arith.constant 0.000000e+00 : f32
    %38 = vector.broadcast %cst_24 : f32 to vector<8x128xf32>
    %39 = arith.select %37, %34, %38 : vector<8x128xi1>, vector<8x128xf32>
    %cst_25 = arith.constant dense<0.000000e+00> : vector<8xf32>
    %40 = vector.multi_reduction <add>, %39, %cst_25 [1] : vector<8x128xf32> to vector<8xf32>
    %41 = vector.shape_cast %40 : vector<8xf32> to vector<8x1xf32>
    %42 = arith.subf %12, %15 : vector<8x1xf32>
    %cst_26 = arith.constant 0.000000e+00 : f32
    %43 = vector.broadcast %cst_26 : f32 to vector<8x1xf32>
    %44 = arith.subf %43, %42 : vector<8x1xf32>
    %cst_27 = arith.constant 0.000000e+00 : f32
    %45 = vector.broadcast %cst_27 : f32 to vector<8x1xf32>
    %46 = arith.maximumf %44, %45 : vector<8x1xf32>
    %47 = math.absf %42 : vector<8x1xf32>
    %cst_28 = arith.constant 0.000000e+00 : f32
    %48 = vector.broadcast %cst_28 : f32 to vector<8x1xf32>
    %49 = arith.subf %48, %47 : vector<8x1xf32>
    %50 = math.exp %49 : vector<8x1xf32>
    %51 = math.log1p %50 : vector<8x1xf32>
    %52 = arith.addf %46, %51 : vector<8x1xf32>
    %c0_29 = arith.constant 0 : index
    %c0_30 = arith.constant 0 : index
    %53 = vector.load %arg11[%c0_29, %c0_30] : memref<8x4xf32, #tpu.memory_space<vmem>>, vector<8x1xf32>
    tpu.vector_store %arg11[%c0_29, %c0_30], %12 {strides = array<i32>} : memref<8x4xf32, #tpu.memory_space<vmem>>, vector<8x1xf32>,
    %c0_31 = arith.constant 0 : index
    %c1 = arith.constant 1 : index
    %54 = vector.load %arg11[%c0_31, %c1] : memref<8x4xf32, #tpu.memory_space<vmem>>, vector<8x1xf32>
    tpu.vector_store %arg11[%c0_31, %c1], %15 {strides = array<i32>} : memref<8x4xf32, #tpu.memory_space<vmem>>, vector<8x1xf32>,
    %c0_32 = arith.constant 0 : index
    %c2 = arith.constant 2 : index
    %55 = vector.load %arg11[%c0_32, %c2] : memref<8x4xf32, #tpu.memory_space<vmem>>, vector<8x1xf32>
    tpu.vector_store %arg11[%c0_32, %c2], %41 {strides = array<i32>} : memref<8x4xf32, #tpu.memory_space<vmem>>, vector<8x1xf32>,
    %c0_33 = arith.constant 0 : index
    %c3 = arith.constant 3 : index
    %56 = vector.load %arg11[%c0_33, %c3] : memref<8x4xf32, #tpu.memory_space<vmem>>, vector<8x1xf32>
    tpu.vector_store %arg11[%c0_33, %c3], %52 {strides = array<i32>} : memref<8x4xf32, #tpu.memory_space<vmem>>, vector<8x1xf32>,
    return
  }
  func.func @transform_0(%arg0: i32) -> (i32, i32) {
    %c0_i32 = arith.constant 0 : i32
    %c0_i32_0 = arith.constant 0 : i32
    return %arg0, %c0_i32 : i32, i32
  }
  func.func @transform_1(%arg0: i32) -> (i32, i32) {
    %c0_i32 = arith.constant 0 : i32
    %c0_i32_0 = arith.constant 0 : i32
    return %arg0, %c0_i32 : i32, i32
  }
  func.func @transform_2(%arg0: i32) -> (i32, i32) {
    %c0_i32 = arith.constant 0 : i32
    %c0_i32_0 = arith.constant 0 : i32
    return %arg0, %c0_i32 : i32, i32
  }
  func.func @transform_3(%arg0: i32) -> (i32, i32) {
    %c0_i32 = arith.constant 0 : i32
    %c0_i32_0 = arith.constant 0 : i32
    return %arg0, %c0_i32 : i32, i32
  }
  func.func @transform_4(%arg0: i32) -> (i32, i32) {
    %c0_i32 = arith.constant 0 : i32
    %c0_i32_0 = arith.constant 0 : i32
    return %arg0, %c0_i32 : i32, i32
  }
  func.func @transform_5(%arg0: i32) -> (i32, i32) {
    %c0_i32 = arith.constant 0 : i32
    %c0_i32_0 = arith.constant 0 : i32
    %c0_i32_1 = arith.constant 0 : i32
    return %c0_i32, %c0_i32_0 : i32, i32
  }
  func.func @transform_6(%arg0: i32) -> (i32, i32) {
    %c0_i32 = arith.constant 0 : i32
    %c0_i32_0 = arith.constant 0 : i32
    %c0_i32_1 = arith.constant 0 : i32
    return %c0_i32, %c0_i32_0 : i32, i32
  }
  func.func @transform_7(%arg0: i32) -> (i32, i32) {
    %c0_i32 = arith.constant 0 : i32
    %c0_i32_0 = arith.constant 0 : i32
    %c0_i32_1 = arith.constant 0 : i32
    return %c0_i32, %c0_i32_0 : i32, i32
  }
  func.func @transform_8(%arg0: i32) -> (i32, i32) {
    %c0_i32 = arith.constant 0 : i32
    %c0_i32_0 = arith.constant 0 : i32
    %c0_i32_1 = arith.constant 0 : i32
    return %c0_i32, %c0_i32_0 : i32, i32
  }
  func.func @transform_9(%arg0: i32) -> (i32, i32) {
    %c0_i32 = arith.constant 0 : i32
    %c0_i32_0 = arith.constant 0 : i32
    return %arg0, %c0_i32 : i32, i32
  }
  func.func @transform_10(%arg0: i32) -> (i32, i32) {
    %c0_i32 = arith.constant 0 : i32
    %c0_i32_0 = arith.constant 0 : i32
    return %arg0, %c0_i32 : i32, i32
  }
}

</mosaic_0001>

<bundles_post_ra>
// kernel: tpu_custom_call.1
= control target key start
LH: loop header
LB: loop body
LE: loop exit
PB: predicated region body
PF: predicated region fallthrough
CT: control target
= control target key end

     0   :  { %v433_v3 = vmov 0.0|0.0   ;;  %vm434_vm0 = vmmov 0   ;;  %v435_v6 = vmov 0.0   ;;  %s601_s0 = inlined_call_operand.vmem [shape: f32[8,128], index: 0, kind: input, shape index: {}]   ;;  %s602_s1 = inlined_call_operand.vmem [shape: f32[8,32], index: 1, kind: input, shape index: {}]   ;;  %s603_s2 = inlined_call_operand.vmem [shape: f32[8,32], index: 2, kind: input, shape index: {}]   ;;  %s604_s3 = inlined_call_operand.vmem [shape: f32[8,32], index: 3, kind: input, shape index: {}]   ;;  %s605_s4 = inlined_call_operand.vmem [shape: bf16[8,128], index: 4, kind: input, shape index: {}]   ;;  %s606_s5 = inlined_call_operand.vmem [shape: f32[128,32], index: 5, kind: input, shape index: {}]   ;;  %s607_s6 = inlined_call_operand.vmem [shape: f32[1,32], index: 6, kind: input, shape index: {}]   ;;  %s608_s7 = inlined_call_operand.vmem [shape: f32[32,128], index: 7, kind: input, shape index: {}]   ;;  %s609_s8 = inlined_call_operand.vmem [shape: f32[1,128], index: 8, kind: input, shape index: {}]   ;;  %s610_s9 = inlined_call_operand.hbm [shape: f32[8,128], index: 9, kind: output, shape index: {0}]   ;;  %s611_s10 = inlined_call_operand.vmem [shape: f32[8,4], index: 10, kind: output, shape index: {1}]  }
   0x1   :  { %v36_v0 = vld [vmem:[%s606_s5] sm:$0xff]  ;;  %v37_v1 = vld [vmem:[%s606_s5 + $0x8] sm:$0xff]  ;;  %v38_v2 = vld [vmem:[%s606_s5 + $0x10] sm:$0xff]  ;;  %367 = vmatprep.subr.bf16.mxu0 %v433_v3  ;;  %353 = vmatprep.mubr.msk.f32.mxu0 %vm434_vm0, %v435_v6 }
   0x2   :  { %v368_v4 = vpack.c.bf16 %v37_v1, %v36_v0  ;;  %v39_v5 = vld [vmem:[%s606_s5 + $0x18] sm:$0xff]  ;;  %391 = vmatprep.subr.bf16.mxu1 %v433_v3  ;;  %364 = vmatprep.mubr.msk.f32.mxu1 %vm434_vm0, %v435_v6  ;;  %v40_v8 = vld [vmem:[%s606_s5 + $0x20] sm:$0xff]  ;;  %v41_v9 = vld [vmem:[%s606_s5 + $0x28] sm:$0xff] }
   0x3   :  { %v371_v7 = vpack.c.bf16 %v39_v5, %v38_v2 }
   0x4   :  { %369 = vmatpush3.bf16.msra.mxu0 %v368_v4 }
   0x5   :  { %370 = vmatprep.subr.bf16.mxu0 %v433_v3 }
   0x6   :  { %16 = vsyncpa [#allocation3], 0  ;;  %v374_v10 = vpack.c.bf16 %v41_v9, %v40_v8  ;;  %v42_v11 = vld [vmem:[%s606_s5 + $0x30] sm:$0xff]  ;;  %v43_v12 = vld [vmem:[%s606_s5 + $0x38] sm:$0xff]  ;;  %vm134_vm1 = vcmask 261120   ;;  %vm270_vm2 = vcmask 7168   ;;  %v247_v61 = vlaneseq }
   0x7   :  { %v377_v13 = vpack.c.bf16 %v43_v12, %v42_v11  ;;  %v44_v14 = vld [vmem:[%s606_s5 + $0x40] sm:$0xff]  ;;  %v45_v15 = vld [vmem:[%s606_s5 + $0x48] sm:$0xff]  ;;  %v46_v17 = vld [vmem:[%s606_s5 + $0x50] sm:$0xff]  ;;  %vm272_vm3 = vcmask 15368  }
   0x8   :  { %372 = vmatpush3.bf16.msra.mxu0 %v371_v7  ;;  %v380_v16 = vpack.c.bf16 %v45_v15, %v44_v14  ;;  %v47_v18 = vld [vmem:[%s606_s5 + $0x58] sm:$0xff]  ;;  %v48_v20 = vld [vmem:[%s606_s5 + $0x60] sm:$0xff]  ;;  %v49_v21 = vld [vmem:[%s606_s5 + $0x68] sm:$0xff]  ;;  %v248_v2 = vand.u32 127, %v247_v61 }
   0x9   :  { %373 = vmatprep.subr.bf16.mxu0 %v433_v3  ;;  %v383_v19 = vpack.c.bf16 %v47_v18, %v46_v17  ;;  %v386_v22 = vpack.c.bf16 %v49_v21, %v48_v20  ;;  %v50_v23 = vld [vmem:[%s606_s5 + $0x70] sm:$0xff]  ;;  %v51_v24 = vld [vmem:[%s606_s5 + $0x78] sm:$0xff]  ;;  %v35_v26 = vld [vmem:[%s601_s0] sm:$0xff] }
   0xa   :  { %v389_v25 = vpack.c.bf16 %v51_v24, %v50_v23  ;;  %v143_v27 = vld [vmem:[%s608_s7] sm:$0xff]  ;;  %v144_v28 = vld [vmem:[%s608_s7 + $0x8] sm:$0xff]  ;;  %v145_v30 = vld [vmem:[%s608_s7 + $0x10] sm:$0xff]  ;;  %vm249_vm5 = vcmp.lt.s32.totalorder %v248_v2, 16 }
   0xb   :  { %v392_v29 = vpack.c.bf16 %v144_v28, %v143_v27  ;;  %v146_v31 = vld [vmem:[%s608_s7 + $0x18] sm:$0xff]  ;;  %v296_v33 = vld [vmem:[%s607_s6] ss:$0 sm:$0xff] }
   0xc   :  { %375 = vmatpush3.bf16.msra.mxu0 %v374_v10  ;;  %v395_v32 = vpack.c.bf16 %v146_v31, %v145_v30  ;;  %v129_v35 = vld [vmem:[%s602_s1] sm:$0xff] }
   0xd   :  { %376 = vmatprep.subr.bf16.mxu0 %v433_v3  ;;  %393 = vmatpush3.bf16.msra.mxu1 %v392_v29  ;;  %v131_v38 = vld [vmem:[%s603_s2] sm:$0xff] }
   0xe   :  { %394 = vmatprep.subr.bf16.mxu1 %v433_v3  ;;  %v132_v40 = vld [vmem:[%s604_s3] sm:$0xff] }
   0xf   :  { %v297_v49 = vld [vmem:[%s609_s8] ss:$0 sm:$0xff]  ;;  %s436_s8 = smov [#allocation2]  }
  0x10   :  { %378 = vmatpush3.bf16.msra.mxu0 %v377_v13  ;;  %v228_v58 = vld [vmem:[%s605_s4] sm:$0xf]  ;;  %s284_s4 = sshll.u32 %s436_s8, 4  ;;  %s285_s4 = int_to_ptr.vmem [resolvable:$true] %s284_s4 }
  0x11   :  { %379 = vmatprep.subr.bf16.mxu0 %v433_v3  ;;  %396 = vmatpush3.bf16.msra.mxu1 %v395_v32  ;;  %v229_v60 = vunpack.c.l.bf16 %v228_v58  ;;  %s409_s24 = scalar_lea.vmem %s285_s4, 128  ;;  %p414_p1 = scmp.lt.s32.totalorder %s285_s4, %s285_s4 }
  0x12   :  { %p410_p0 = scmp.ne.s32.totalorder %s285_s4, %s409_s24  ;;  %p415_p2 = scmp.lt.s32.totalorder %s409_s24, %s409_s24 }
  0x14   :  { %381 = vmatpush3.bf16.msra.mxu0 %v380_v16  ;;  %p416_p3 = por %p415_p2, %p414_p1 }
  0x15   :  { %382 = vmatprep.subr.bf16.mxu0 %v433_v3 }
  0x16   :  { %p417_p4 = pnand %p416_p3, %p410_p0 }
  0x18   :  { %384 = vmatpush3.bf16.msra.mxu0 %v383_v19 }
  0x19   :  { %385 = vmatprep.subr.bf16.mxu0 %v433_v3 }
  0x1c   :  { %387 = vmatpush3.bf16.msra.mxu0 %v386_v22 }
  0x1d   :  { %388 = vmatprep.subr.bf16.mxu0 %v433_v3 }
  0x20   :  { %390 = vmatpush3.bf16.msra.mxu0 %v389_v25 }
  0x23   :  { %354 = vmatmul.mubr.f32.vlgmr.msra.gmra.mrb[0].mxu0 %v35_v26 }
  0xf6   :  { %v125_v34 = vpop.f32.mrb[0].mxu0 }
  0xf7   :  { %v126_v36 = vadd.f32 %v296_v33, %v125_v34  ;;  %v355_v37 = vpop.f32.mrb[1].mxu0 }
  0xf9   :  { %v130_v39 = vadd.f32 %v129_v35, %v126_v36 }
  0xfb   :  { %v142_v41 = vadd.f32 %v131_v38, %v130_v39  ;;  %v133_v42 = vmul.f32 %v131_v38, %v130_v39  ;;  %v138_v44 = vmul.f32 %v132_v40, %v130_v39 }
  0xfd   :  { %365 = vmatmul.mubr.msk.f32.vlgmr.msra.gmra.mrb[0].mxu1 %vm134_vm1, %v142_v41  ;;  %v135_v43 = vsel %vm134_vm1, %v133_v42, 0.0  ;;  %v139_v45 = vsel %vm134_vm1, %v138_v44, 0.0 }
  0xfe   :  { %136 = vadd.xlane.f32.xlu0 %v135_v43 }
 0x102   :  { %140 = vadd.xlane.f32.xlu0 %v139_v45 }
 0x18b   :  { %v137_v46 = vpop.xlane.xlu0 %136 }
 0x18c   :  { %271 = vst.msk [vmem:[%s611_s10] sm:$0xff] %vm270_vm2, %v137_v46 }
 0x18f   :  { %v141_v47 = vpop.xlane.xlu0 %140 }
 0x190   :  { %v570_v48 = vsub.f32 %v137_v46, %v141_v47  ;;  %273 = vst.msk [vmem:[%s611_s10] sm:$0xff] %vm272_vm3, %v141_v47 }
 0x1d0   :  { %v223_v50 = vpop.f32.mrb[0].mxu1 }
 0x1d1   :  { %v224_v51 = vadd.f32 %v297_v49, %v223_v50  ;;  %v366_v52 = vpop.f32.mrb[1].mxu1 }
 0x1d3   :  { %v233_v53 = vand.u32 2147483647, %v224_v51  ;;  %227 = vst [vmem:[#allocation2] sm:$0xff] %v224_v51  ;;  %v230_v63 = vmax.f32 %v224_v51, 0.0  ;;  %v231_v0 = vmul.f32 %v229_v60, %v224_v51 }
 0x1d5   :  { %v234_v54 = vsub.f32 0.0, %v233_v53  ;;  %v232_v6 = vsub.f32 %v230_v63, %v231_v0 }
 0x1d7   :  { %v235_v55 = vmul.f32 1.442695, %v234_v54 }
 0x1d9   :  { %401 = vpow2.f32 %v235_v55 }
 0x1e3   :  { %v402_v56 = vpop.eup %401 }
 0x1e4   :  { %v237_v57 = vadd.f32 1.0, %v402_v56  ;;  %v240_v59 = vmul.f32 -0.5, %v402_v56  ;;  %v243_v1 = vand.u32 2147483647, %v402_v56 }
 0x1e6   :  { %403 = vlog2.f32 %v237_v57  ;;  %v241_v62 = vadd.f32 1.0, %v240_v59  ;;  %vm244_vm4 = vcmp.lt.f32.partialorder %v243_v1, 0.0004427343 }
 0x1e8   :  { %v242_v5 = vmul.f32 %v402_v56, %v241_v62 }
 0x1f0   :  { %v404_v3 = vpop.eup %403 }
 0x1f1   :  { %v239_v4 = vmul.f32 0.6931472, %v404_v3 }
 0x1f3   :  { %v245_v7 = vsel %vm244_vm4, %v242_v5, %v239_v4 }
 0x1f4   :  { %v246_v8 = vadd.f32 %v245_v7, %v232_v6 }
 0x1f6   :  { %v250_v9 = vsel %vm249_vm5, %v246_v8, 0.0 }
 0x1f7   :  { %251 = vadd.xlane.f32.xlu1 %v250_v9 }
 0x1f8   :  { %420 = shalt.err (!%p417_p4)
}
 0x1f9   :  { %s421_s27 = scalar_lea.hbm %s610_s9, 128 }
 0x1fa   :  { %p422_p5 = scmp.ne.s32.totalorder %s610_s9, %s421_s27  ;;  %p425_p6 = scmp.lt.u32.totalorder %s421_s27, %s610_s9 }
 0x1fc   :  { %p427_p7 = pnand %p425_p6, %p422_p5 }
 0x1fe   :  { %430 = shalt.err (!%p427_p7)
}
 0x1ff   :  { %287 = dma.vmem_to_hbm [thread:$0]  %s285_s4, 128, %s610_s9, [#allocation3]   ;;  %v256_v10 = vand.u32 2147483647, %v570_v48  ;;  %v254_v20 = vsub.f32 0.0, %v570_v48  ;;  %vm274_vm7 = vcmask 23568  }
 0x200   :  { %vm276_vm8 = vcmask 31768  }
 0x201   :  { %v257_v11 = vsub.f32 0.0, %v256_v10  ;;  %v255_v23 = vmax.f32 %v254_v20, 0.0 }
 0x203   :  { %v258_v12 = vmul.f32 1.442695, %v257_v11 }
 0x205   :  { %405 = vpow2.f32 %v258_v12 }
 0x20f   :  { %v406_v13 = vpop.eup %405 }
 0x210   :  { %v260_v14 = vadd.f32 1.0, %v406_v13  ;;  %v263_v15 = vmul.f32 -0.5, %v406_v13  ;;  %v266_v18 = vand.u32 2147483647, %v406_v13 }
 0x212   :  { %407 = vlog2.f32 %v260_v14  ;;  %v264_v17 = vadd.f32 1.0, %v263_v15  ;;  %vm267_vm6 = vcmp.lt.f32.partialorder %v266_v18, 0.0004427343 }
 0x214   :  { %v265_v21 = vmul.f32 %v406_v13, %v264_v17 }
 0x21c   :  { %v408_v16 = vpop.eup %407 }
 0x21d   :  { %v262_v19 = vmul.f32 0.6931472, %v408_v16 }
 0x21f   :  { %v268_v22 = vsel %vm267_vm6, %v265_v21, %v262_v19 }
 0x220   :  { %v269_v24 = vadd.f32 %v268_v22, %v255_v23 }
 0x284   :  { %v252_v25 = vpop.xlane.xlu1 %251 }
 0x285   :  { %275 = vst.msk [vmem:[%s611_s10] sm:$0xff] %vm274_vm7, %v252_v25 }
 0x286   :  { %277 = vst.msk [vmem:[%s611_s10] sm:$0xff] %vm276_vm8, %v269_v24 }
 0x287   :  { %431 = dma.done.wait [#allocation3], 128  }
 0x288   :  { %432 = vsyncadd [#allocation3], 4294967168 }
 0x289   :  { %295 = vsyncpa [#allocation3], 1 }

</bundles_post_ra>
